<compile_context>
chip_gen: v6e
topology: v6e:2x2x1
jax: 0.10.0
libtpu: 0.0.40
codegen_flags: <defaults>
</compile_context>

<pallas_src>
import math

import jax
import jax.numpy as jnp
from jax.experimental import pallas as pl
from jax.experimental.pallas import tpu as pltpu

_MAX_CHUNK_ROWS = 128            # indices gathered per grid step (statically unrolled)
_SUBLANE = 8                     # f32 sublane packing
_VMEM_LIMIT_TRIGGER = 16 * 1024 * 1024   # only pass vmem_limit_bytes above this


def _round_up(x, m):
    return ((x + m - 1) // m) * m


def _itemsize(dtype):
    return jnp.dtype(dtype).itemsize


def _vmem_physical_bytes():
    """Per-core VMEM capacity; conservative fallback = v7x's 64 MiB."""
    try:
        return int(pltpu.get_tpu_info().vmem_capacity_bytes)
    except Exception:
        return 64 * 1024 * 1024


def _chunk_rows(n):
    """Rows gathered per grid step: multiple of 8, capped for static unrolling."""
    return min(_MAX_CHUNK_ROWS, _round_up(max(n, 1), _SUBLANE))


def _resident_vmem_need(tables, rows):
    """Rough VMEM need: resident tables + output chunks, both double-buffered."""
    need = 0
    for num, dim, isz in tables:
        lanes = _round_up(dim, 128)
        need += 2 * _round_up(num, _SUBLANE) * lanes * isz       # table buffers
        need += 2 * _round_up(rows, _SUBLANE) * lanes * isz      # output chunk buffers
    return need


def _compiler_params(vmem_need):
    kwargs = dict(dimension_semantics=("parallel",))   # v7x: 2 TCs split the chunks
    if vmem_need > _VMEM_LIMIT_TRIGGER:
        kwargs["vmem_limit_bytes"] = int(min(_vmem_physical_bytes(),
                                             vmem_need + (8 << 20)))
    return pltpu.CompilerParams(**kwargs)


# ---------------------------------------------------------------------------
# Kernels
# ---------------------------------------------------------------------------

def _resident_gather_kernel(idx_ref, tab_ref, out_ref):
    """Gather `rows` rows from the VMEM-resident table; indices live in SMEM."""
    rows = out_ref.shape[0]
    base = pl.program_id(0) * rows
    # Static unroll: dynamic-row load from the resident table, static-row store.
    for r in range(rows):
        out_ref[pl.ds(r, 1), :] = tab_ref[pl.ds(idx_ref[base + r], 1), :]


def _fused_resident_gather_kernel(cidx_ref, ridx_ref, ctab_ref, rtab_ref,
                                  cout_ref, rout_ref):
    rows = cout_ref.shape[0]
    base = pl.program_id(0) * rows
    for r in range(rows):
        cout_ref[pl.ds(r, 1), :] = ctab_ref[pl.ds(cidx_ref[base + r], 1), :]
        rout_ref[pl.ds(r, 1), :] = rtab_ref[pl.ds(ridx_ref[base + r], 1), :]


def _row_gather_kernel(idx_ref, tab_row_ref, out_row_ref):
    """Large-vocab fallback: per-row DMA gather via data-dependent index_map."""
    del idx_ref  # consumed only by the index_maps
    out_row_ref[...] = tab_row_ref[...]


# ---------------------------------------------------------------------------
# Lookup wrappers
# ---------------------------------------------------------------------------

def _resident_lookup(flat_idx, table, rows):
    n = flat_idx.shape[0]
    num, dim = table.shape
    chunks = -(-n // rows)
    padded_n = chunks * rows
    # Padded steps gather row 0; their output rows are masked off on writeback.
    idx = jnp.pad(flat_idx, (0, padded_n - n))
    isz = _itemsize(table.dtype)
    need = _resident_vmem_need([(num, dim, isz)], rows)
    ce = pl.CostEstimate(flops=0, transcendentals=0,
                         bytes_accessed=num * dim * isz + n * dim * isz + padded_n * 4)
    return pl.pallas_call(
        _resident_gather_kernel,
        out_shape=jax.ShapeDtypeStruct((n, dim), table.dtype),
        grid_spec=pltpu.PrefetchScalarGridSpec(
            num_scalar_prefetch=1,
            grid=(chunks,),
            in_specs=[
                # Full table, constant block index -> DMA'd once, stays resident.
                pl.BlockSpec((num, dim), lambda i, _idx: (0, 0)),
            ],
            out_specs=pl.BlockSpec((rows, dim), lambda i, _idx: (i, 0)),
        ),
        compiler_params=_compiler_params(need),
        cost_estimate=ce,
    )(idx, table)


def _row_dma_lookup(flat_idx, table):
    """Large-vocab fallback: one embedding row DMA per grid step, deep-buffered."""
    # TODO(synk): could be further improved by chunking R rows/step with manual
    # multi-in-flight pltpu.make_async_copy gathers into a VMEM slab.
    n = flat_idx.shape[0]
    num, dim = table.shape
    isz = _itemsize(table.dtype)
    ce = pl.CostEstimate(flops=0, transcendentals=0,
                         bytes_accessed=2 * n * dim * isz + n * 4)
    try:
        in_spec = pl.BlockSpec((1, dim), lambda i, idx: (idx[i], 0),
                               pipeline_mode=pl.Buffered(4))
        out_spec = pl.BlockSpec((1, dim), lambda i, idx: (i, 0),
                                pipeline_mode=pl.Buffered(4))
    except TypeError:  # older jax without pipeline_mode
        in_spec = pl.BlockSpec((1, dim), lambda i, idx: (idx[i], 0))
        out_spec = pl.BlockSpec((1, dim), lambda i, idx: (i, 0))
    return pl.pallas_call(
        _row_gather_kernel,
        out_shape=jax.ShapeDtypeStruct((n, dim), table.dtype),
        grid_spec=pltpu.PrefetchScalarGridSpec(
            num_scalar_prefetch=1,
            grid=(n,),
            in_specs=[in_spec],
            out_specs=out_spec,
        ),
        compiler_params=pltpu.CompilerParams(dimension_semantics=("parallel",)),
        cost_estimate=ce,
    )(flat_idx, table)


def embedding_lookup(indices, table):
    """indices (any int shape) -> indices.shape + (table_dim,), exact gather."""
    num, dim = table.shape
    orig_shape = tuple(indices.shape)
    flat = indices.reshape(-1).astype(jnp.int32)
    n = flat.shape[0]
    if n == 0:
        return jnp.zeros(orig_shape + (dim,), table.dtype)
    # TODO(synk): PyTorch nn.Embedding raises on out-of-range indices; we clamp
    # instead so the in-kernel dynamic loads stay in bounds (OOB is undefined).
    flat = jnp.clip(flat, 0, num - 1)

    rows = _chunk_rows(n)
    need = _resident_vmem_need([(num, dim, _itemsize(table.dtype))], rows)
    if need <= _vmem_physical_bytes() // 2:
        out = _resident_lookup(flat, table, rows)
    else:
        out = _row_dma_lookup(flat, table)
    return out.reshape(orig_shape + (dim,))


def fused_embedding_lookup(concept_idx, relation_idx, concept_table, relation_table):
    """Both gathers in one pallas_call when index counts match and tables fit VMEM."""
    cnum, cdim = concept_table.shape
    rnum, rdim = relation_table.shape
    c_shape = tuple(concept_idx.shape)
    r_shape = tuple(relation_idx.shape)
    cflat = jnp.clip(concept_idx.reshape(-1).astype(jnp.int32), 0, cnum - 1)
    rflat = jnp.clip(relation_idx.reshape(-1).astype(jnp.int32), 0, rnum - 1)
    nc, nr = cflat.shape[0], rflat.shape[0]

    cisz, risz = _itemsize(concept_table.dtype), _itemsize(relation_table.dtype)
    rows = _chunk_rows(max(nc, 1))
    need = _resident_vmem_need([(cnum, cdim, cisz), (rnum, rdim, risz)], rows)
    if nc != nr or nc == 0 or need > _vmem_physical_bytes() // 2:
        # Different index counts (avoid padded gathers / wasted writebacks) or
        # tables too large for shared residency -> two independent lookups.
        return (embedding_lookup(concept_idx, concept_table),
                embedding_lookup(relation_idx, relation_table))

    chunks = -(-nc // rows)
    padded_n = chunks * rows
    cpad = jnp.pad(cflat, (0, padded_n - nc))
    rpad = jnp.pad(rflat, (0, padded_n - nr))
    ce = pl.CostEstimate(
        flops=0, transcendentals=0,
        bytes_accessed=(cnum * cdim * cisz + rnum * rdim * risz
                        + nc * cdim * cisz + nr * rdim * risz + 2 * padded_n * 4))

    cout, rout = pl.pallas_call(
        _fused_resident_gather_kernel,
        out_shape=(jax.ShapeDtypeStruct((nc, cdim), concept_table.dtype),
                   jax.ShapeDtypeStruct((nr, rdim), relation_table.dtype)),
        grid_spec=pltpu.PrefetchScalarGridSpec(
            num_scalar_prefetch=2,
            grid=(chunks,),
            in_specs=[
                pl.BlockSpec((cnum, cdim), lambda i, c, r: (0, 0)),   # resident
                pl.BlockSpec((rnum, rdim), lambda i, c, r: (0, 0)),   # resident
            ],
            out_specs=[
                pl.BlockSpec((rows, cdim), lambda i, c, r: (i, 0)),
                pl.BlockSpec((rows, rdim), lambda i, c, r: (i, 0)),
            ],
        ),
        compiler_params=_compiler_params(need),
        cost_estimate=ce,
    )(cpad, rpad, concept_table, relation_table)

    return (cout.reshape(c_shape + (cdim,)), rout.reshape(r_shape + (rdim,)))


# ---------------------------------------------------------------------------
# Module wrapper
# ---------------------------------------------------------------------------

class ConceptEmbeddingModelPallas:
    """JAX/Pallas equivalent of the PyTorch ConceptEmbeddingModel."""

    def __init__(self, concept_num, relation_num, concept_dim, relation_dim, key,
                 pretrained_concept=None, pretrained_relation=None):
        self.concept_num = concept_num
        self.relation_num = relation_num
        self.concept_dim = concept_dim
        self.relation_dim = relation_dim
        kc, kr = jax.random.split(key)

        if pretrained_concept is not None:
            self.concept_weight = jnp.asarray(pretrained_concept, jnp.float32)
        else:
            cb = math.sqrt(6.0 / concept_dim)
            self.concept_weight = jax.random.uniform(
                kc, (concept_num, concept_dim), jnp.float32, -cb, cb)
        if pretrained_relation is not None:
            self.relation_weight = jnp.asarray(pretrained_relation, jnp.float32)
        else:
            rb = math.sqrt(6.0 / relation_dim)
            self.relation_weight = jax.random.uniform(
                kr, (relation_num, relation_dim), jnp.float32, -rb, rb)

    def forward(self, concept_inp, relation_inp):
        if concept_inp is not None and relation_inp is not None:
            return fused_embedding_lookup(concept_inp, relation_inp,
                                          self.concept_weight, self.relation_weight)
        concept_output = None
        relation_output = None
        if concept_inp is not None:
            concept_output = embedding_lookup(concept_inp, self.concept_weight)
        if relation_inp is not None:
            relation_output = embedding_lookup(relation_inp, self.relation_weight)
        return concept_output, relation_output


if __name__ == "__main__":
    key = jax.random.PRNGKey(0)
    k_params, k_cidx, k_ridx = jax.random.split(key, 3)

    # Small synthetic config: 50 concepts (dim 128), 17 relations (dim 64)
    concept_num, concept_dim = 50, 128
    relation_num, relation_dim = 17, 64
    batch, seq = 2, 8

    model = ConceptEmbeddingModelPallas(
        concept_num, relation_num, concept_dim, relation_dim, k_params)

    concept_inp = jax.random.randint(k_cidx, (batch, seq), 0, concept_num, jnp.int32)
    relation_inp = jax.random.randint(k_ridx, (batch, seq), 0, relation_num, jnp.int32)

    # Fused resident-table path (equal index counts).
    concept_out, relation_out = model.forward(concept_inp, relation_inp)
    concept_out = jax.block_until_ready(concept_out)
    relation_out = jax.block_until_ready(relation_out)

    concept_ref = model.concept_weight[concept_inp]
    relation_ref = model.relation_weight[relation_inp]

    assert concept_out.shape == (batch, seq, concept_dim)
    assert relation_out.shape == (batch, seq, relation_dim)
    assert jnp.array_equal(concept_out, concept_ref)
    assert jnp.array_equal(relation_out, relation_ref)

    # None branch (single-lookup path).
    c_only, r_none = model.forward(concept_inp, None)
    c_only = jax.block_until_ready(c_only)
    assert r_none is None
    assert jnp.array_equal(c_only, concept_ref)

    # Mismatched index counts -> two independent (unpadded) lookups.
    relation_inp2 = relation_inp[:, :4]
    c2, r2 = model.forward(concept_inp, relation_inp2)
    r2 = jax.block_until_ready(r2)
    assert jnp.array_equal(c2, concept_ref)
    assert jnp.array_equal(r2, model.relation_weight[relation_inp2])

    print("KERNEL_OK")
</pallas_src>

<mosaic_0001>
module attributes {stable_mosaic.version = 11 : i64} {
  func.func @_fused_resident_gather_kernel(%arg0: i32, %arg1: memref<16xi32, #tpu.memory_space<smem>>, %arg2: memref<16xi32, #tpu.memory_space<smem>>, %arg3: memref<50x128xf32, #tpu.memory_space<vmem>>, %arg4: memref<17x64xf32, #tpu.memory_space<vmem>>, %arg5: memref<16x128xf32, #tpu.memory_space<vmem>>, %arg6: memref<16x64xf32, #tpu.memory_space<vmem>>) attributes {dimension_semantics = [#tpu.dimension_semantics<parallel>], iteration_bounds = array<i64: 1>, scalar_prefetch = 2 : i64, scratch_operands = 0 : i64, tpu.core_type = #tpu.core_type<tc>, window_params = [{pipeline_mode = #tpu.pipeline_mode<synchronous>, transform_indices = @transform_0, window_bounds = array<i64: 50, 128>}, {pipeline_mode = #tpu.pipeline_mode<synchronous>, transform_indices = @transform_1, window_bounds = array<i64: 17, 64>}, {transform_indices = @transform_2, window_bounds = array<i64: 16, 128>}, {transform_indices = @transform_3, window_bounds = array<i64: 16, 64>}]} {
    %c16_i32 = arith.constant 16 : i32
    %0 = arith.muli %arg0, %c16_i32 : i32
    %c0_i32 = arith.constant 0 : i32
    %1 = arith.addi %0, %c0_i32 : i32
    %2 = arith.index_cast %1 : i32 to index
    %3 = memref.load %arg1[%2] : memref<16xi32, #tpu.memory_space<smem>>
    %4 = arith.index_cast %3 : i32 to index
    %c0 = arith.constant 0 : index
    %5 = vector.load %arg3[%4, %c0] : memref<50x128xf32, #tpu.memory_space<vmem>>, vector<1x128xf32>
    %c0_0 = arith.constant 0 : index
    %c0_1 = arith.constant 0 : index
    %6 = vector.load %arg5[%c0_0, %c0_1] : memref<16x128xf32, #tpu.memory_space<vmem>>, vector<1x128xf32>
    tpu.vector_store %arg5[%c0_0, %c0_1], %5 {strides = array<i32>} : memref<16x128xf32, #tpu.memory_space<vmem>>, vector<1x128xf32>,
    %c0_i32_2 = arith.constant 0 : i32
    %7 = arith.addi %0, %c0_i32_2 : i32
    %8 = arith.index_cast %7 : i32 to index
    %9 = memref.load %arg2[%8] : memref<16xi32, #tpu.memory_space<smem>>
    %10 = arith.index_cast %9 : i32 to index
    %c0_3 = arith.constant 0 : index
    %11 = vector.load %arg4[%10, %c0_3] : memref<17x64xf32, #tpu.memory_space<vmem>>, vector<1x64xf32>
    %c0_4 = arith.constant 0 : index
    %c0_5 = arith.constant 0 : index
    %12 = vector.load %arg6[%c0_4, %c0_5] : memref<16x64xf32, #tpu.memory_space<vmem>>, vector<1x64xf32>
    tpu.vector_store %arg6[%c0_4, %c0_5], %11 {strides = array<i32>} : memref<16x64xf32, #tpu.memory_space<vmem>>, vector<1x64xf32>,
    %c1_i32 = arith.constant 1 : i32
    %13 = arith.addi %0, %c1_i32 : i32
    %14 = arith.index_cast %13 : i32 to index
    %15 = memref.load %arg1[%14] : memref<16xi32, #tpu.memory_space<smem>>
    %16 = arith.index_cast %15 : i32 to index
    %c0_6 = arith.constant 0 : index
    %17 = vector.load %arg3[%16, %c0_6] : memref<50x128xf32, #tpu.memory_space<vmem>>, vector<1x128xf32>
    %c1 = arith.constant 1 : index
    %c0_7 = arith.constant 0 : index
    %18 = vector.load %arg5[%c1, %c0_7] : memref<16x128xf32, #tpu.memory_space<vmem>>, vector<1x128xf32>
    tpu.vector_store %arg5[%c1, %c0_7], %17 {strides = array<i32>} : memref<16x128xf32, #tpu.memory_space<vmem>>, vector<1x128xf32>,
    %c1_i32_8 = arith.constant 1 : i32
    %19 = arith.addi %0, %c1_i32_8 : i32
    %20 = arith.index_cast %19 : i32 to index
    %21 = memref.load %arg2[%20] : memref<16xi32, #tpu.memory_space<smem>>
    %22 = arith.index_cast %21 : i32 to index
    %c0_9 = arith.constant 0 : index
    %23 = vector.load %arg4[%22, %c0_9] : memref<17x64xf32, #tpu.memory_space<vmem>>, vector<1x64xf32>
    %c1_10 = arith.constant 1 : index
    %c0_11 = arith.constant 0 : index
    %24 = vector.load %arg6[%c1_10, %c0_11] : memref<16x64xf32, #tpu.memory_space<vmem>>, vector<1x64xf32>
    tpu.vector_store %arg6[%c1_10, %c0_11], %23 {strides = array<i32>} : memref<16x64xf32, #tpu.memory_space<vmem>>, vector<1x64xf32>,
    %c2_i32 = arith.constant 2 : i32
    %25 = arith.addi %0, %c2_i32 : i32
    %26 = arith.index_cast %25 : i32 to index
    %27 = memref.load %arg1[%26] : memref<16xi32, #tpu.memory_space<smem>>
    %28 = arith.index_cast %27 : i32 to index
    %c0_12 = arith.constant 0 : index
    %29 = vector.load %arg3[%28, %c0_12] : memref<50x128xf32, #tpu.memory_space<vmem>>, vector<1x128xf32>
    %c2 = arith.constant 2 : index
    %c0_13 = arith.constant 0 : index
    %30 = vector.load %arg5[%c2, %c0_13] : memref<16x128xf32, #tpu.memory_space<vmem>>, vector<1x128xf32>
    tpu.vector_store %arg5[%c2, %c0_13], %29 {strides = array<i32>} : memref<16x128xf32, #tpu.memory_space<vmem>>, vector<1x128xf32>,
    %c2_i32_14 = arith.constant 2 : i32
    %31 = arith.addi %0, %c2_i32_14 : i32
    %32 = arith.index_cast %31 : i32 to index
    %33 = memref.load %arg2[%32] : memref<16xi32, #tpu.memory_space<smem>>
    %34 = arith.index_cast %33 : i32 to index
    %c0_15 = arith.constant 0 : index
    %35 = vector.load %arg4[%34, %c0_15] : memref<17x64xf32, #tpu.memory_space<vmem>>, vector<1x64xf32>
    %c2_16 = arith.constant 2 : index
    %c0_17 = arith.constant 0 : index
    %36 = vector.load %arg6[%c2_16, %c0_17] : memref<16x64xf32, #tpu.memory_space<vmem>>, vector<1x64xf32>
    tpu.vector_store %arg6[%c2_16, %c0_17], %35 {strides = array<i32>} : memref<16x64xf32, #tpu.memory_space<vmem>>, vector<1x64xf32>,
    %c3_i32 = arith.constant 3 : i32
    %37 = arith.addi %0, %c3_i32 : i32
    %38 = arith.index_cast %37 : i32 to index
    %39 = memref.load %arg1[%38] : memref<16xi32, #tpu.memory_space<smem>>
    %40 = arith.index_cast %39 : i32 to index
    %c0_18 = arith.constant 0 : index
    %41 = vector.load %arg3[%40, %c0_18] : memref<50x128xf32, #tpu.memory_space<vmem>>, vector<1x128xf32>
    %c3 = arith.constant 3 : index
    %c0_19 = arith.constant 0 : index
    %42 = vector.load %arg5[%c3, %c0_19] : memref<16x128xf32, #tpu.memory_space<vmem>>, vector<1x128xf32>
    tpu.vector_store %arg5[%c3, %c0_19], %41 {strides = array<i32>} : memref<16x128xf32, #tpu.memory_space<vmem>>, vector<1x128xf32>,
    %c3_i32_20 = arith.constant 3 : i32
    %43 = arith.addi %0, %c3_i32_20 : i32
    %44 = arith.index_cast %43 : i32 to index
    %45 = memref.load %arg2[%44] : memref<16xi32, #tpu.memory_space<smem>>
    %46 = arith.index_cast %45 : i32 to index
    %c0_21 = arith.constant 0 : index
    %47 = vector.load %arg4[%46, %c0_21] : memref<17x64xf32, #tpu.memory_space<vmem>>, vector<1x64xf32>
    %c3_22 = arith.constant 3 : index
    %c0_23 = arith.constant 0 : index
    %48 = vector.load %arg6[%c3_22, %c0_23] : memref<16x64xf32, #tpu.memory_space<vmem>>, vector<1x64xf32>
    tpu.vector_store %arg6[%c3_22, %c0_23], %47 {strides = array<i32>} : memref<16x64xf32, #tpu.memory_space<vmem>>, vector<1x64xf32>,
    %c4_i32 = arith.constant 4 : i32
    %49 = arith.addi %0, %c4_i32 : i32
    %50 = arith.index_cast %49 : i32 to index
    %51 = memref.load %arg1[%50] : memref<16xi32, #tpu.memory_space<smem>>
    %52 = arith.index_cast %51 : i32 to index
    %c0_24 = arith.constant 0 : index
    %53 = vector.load %arg3[%52, %c0_24] : memref<50x128xf32, #tpu.memory_space<vmem>>, vector<1x128xf32>
    %c4 = arith.constant 4 : index
    %c0_25 = arith.constant 0 : index
    %54 = vector.load %arg5[%c4, %c0_25] : memref<16x128xf32, #tpu.memory_space<vmem>>, vector<1x128xf32>
    tpu.vector_store %arg5[%c4, %c0_25], %53 {strides = array<i32>} : memref<16x128xf32, #tpu.memory_space<vmem>>, vector<1x128xf32>,
    %c4_i32_26 = arith.constant 4 : i32
    %55 = arith.addi %0, %c4_i32_26 : i32
    %56 = arith.index_cast %55 : i32 to index
    %57 = memref.load %arg2[%56] : memref<16xi32, #tpu.memory_space<smem>>
    %58 = arith.index_cast %57 : i32 to index
    %c0_27 = arith.constant 0 : index
    %59 = vector.load %arg4[%58, %c0_27] : memref<17x64xf32, #tpu.memory_space<vmem>>, vector<1x64xf32>
    %c4_28 = arith.constant 4 : index
    %c0_29 = arith.constant 0 : index
    %60 = vector.load %arg6[%c4_28, %c0_29] : memref<16x64xf32, #tpu.memory_space<vmem>>, vector<1x64xf32>
    tpu.vector_store %arg6[%c4_28, %c0_29], %59 {strides = array<i32>} : memref<16x64xf32, #tpu.memory_space<vmem>>, vector<1x64xf32>,
    %c5_i32 = arith.constant 5 : i32
    %61 = arith.addi %0, %c5_i32 : i32
    %62 = arith.index_cast %61 : i32 to index
    %63 = memref.load %arg1[%62] : memref<16xi32, #tpu.memory_space<smem>>
    %64 = arith.index_cast %63 : i32 to index
    %c0_30 = arith.constant 0 : index
    %65 = vector.load %arg3[%64, %c0_30] : memref<50x128xf32, #tpu.memory_space<vmem>>, vector<1x128xf32>
    %c5 = arith.constant 5 : index
    %c0_31 = arith.constant 0 : index
    %66 = vector.load %arg5[%c5, %c0_31] : memref<16x128xf32, #tpu.memory_space<vmem>>, vector<1x128xf32>
    tpu.vector_store %arg5[%c5, %c0_31], %65 {strides = array<i32>} : memref<16x128xf32, #tpu.memory_space<vmem>>, vector<1x128xf32>,
    %c5_i32_32 = arith.constant 5 : i32
    %67 = arith.addi %0, %c5_i32_32 : i32
    %68 = arith.index_cast %67 : i32 to index
    %69 = memref.load %arg2[%68] : memref<16xi32, #tpu.memory_space<smem>>
    %70 = arith.index_cast %69 : i32 to index
    %c0_33 = arith.constant 0 : index
    %71 = vector.load %arg4[%70, %c0_33] : memref<17x64xf32, #tpu.memory_space<vmem>>, vector<1x64xf32>
    %c5_34 = arith.constant 5 : index
    %c0_35 = arith.constant 0 : index
    %72 = vector.load %arg6[%c5_34, %c0_35] : memref<16x64xf32, #tpu.memory_space<vmem>>, vector<1x64xf32>
    tpu.vector_store %arg6[%c5_34, %c0_35], %71 {strides = array<i32>} : memref<16x64xf32, #tpu.memory_space<vmem>>, vector<1x64xf32>,
    %c6_i32 = arith.constant 6 : i32
    %73 = arith.addi %0, %c6_i32 : i32
    %74 = arith.index_cast %73 : i32 to index
    %75 = memref.load %arg1[%74] : memref<16xi32, #tpu.memory_space<smem>>
    %76 = arith.index_cast %75 : i32 to index
    %c0_36 = arith.constant 0 : index
    %77 = vector.load %arg3[%76, %c0_36] : memref<50x128xf32, #tpu.memory_space<vmem>>, vector<1x128xf32>
    %c6 = arith.constant 6 : index
    %c0_37 = arith.constant 0 : index
    %78 = vector.load %arg5[%c6, %c0_37] : memref<16x128xf32, #tpu.memory_space<vmem>>, vector<1x128xf32>
    tpu.vector_store %arg5[%c6, %c0_37], %77 {strides = array<i32>} : memref<16x128xf32, #tpu.memory_space<vmem>>, vector<1x128xf32>,
    %c6_i32_38 = arith.constant 6 : i32
    %79 = arith.addi %0, %c6_i32_38 : i32
    %80 = arith.index_cast %79 : i32 to index
    %81 = memref.load %arg2[%80] : memref<16xi32, #tpu.memory_space<smem>>
    %82 = arith.index_cast %81 : i32 to index
    %c0_39 = arith.constant 0 : index
    %83 = vector.load %arg4[%82, %c0_39] : memref<17x64xf32, #tpu.memory_space<vmem>>, vector<1x64xf32>
    %c6_40 = arith.constant 6 : index
    %c0_41 = arith.constant 0 : index
    %84 = vector.load %arg6[%c6_40, %c0_41] : memref<16x64xf32, #tpu.memory_space<vmem>>, vector<1x64xf32>
    tpu.vector_store %arg6[%c6_40, %c0_41], %83 {strides = array<i32>} : memref<16x64xf32, #tpu.memory_space<vmem>>, vector<1x64xf32>,
    %c7_i32 = arith.constant 7 : i32
    %85 = arith.addi %0, %c7_i32 : i32
    %86 = arith.index_cast %85 : i32 to index
    %87 = memref.load %arg1[%86] : memref<16xi32, #tpu.memory_space<smem>>
    %88 = arith.index_cast %87 : i32 to index
    %c0_42 = arith.constant 0 : index
    %89 = vector.load %arg3[%88, %c0_42] : memref<50x128xf32, #tpu.memory_space<vmem>>, vector<1x128xf32>
    %c7 = arith.constant 7 : index
    %c0_43 = arith.constant 0 : index
    %90 = vector.load %arg5[%c7, %c0_43] : memref<16x128xf32, #tpu.memory_space<vmem>>, vector<1x128xf32>
    tpu.vector_store %arg5[%c7, %c0_43], %89 {strides = array<i32>} : memref<16x128xf32, #tpu.memory_space<vmem>>, vector<1x128xf32>,
    %c7_i32_44 = arith.constant 7 : i32
    %91 = arith.addi %0, %c7_i32_44 : i32
    %92 = arith.index_cast %91 : i32 to index
    %93 = memref.load %arg2[%92] : memref<16xi32, #tpu.memory_space<smem>>
    %94 = arith.index_cast %93 : i32 to index
    %c0_45 = arith.constant 0 : index
    %95 = vector.load %arg4[%94, %c0_45] : memref<17x64xf32, #tpu.memory_space<vmem>>, vector<1x64xf32>
    %c7_46 = arith.constant 7 : index
    %c0_47 = arith.constant 0 : index
    %96 = vector.load %arg6[%c7_46, %c0_47] : memref<16x64xf32, #tpu.memory_space<vmem>>, vector<1x64xf32>
    tpu.vector_store %arg6[%c7_46, %c0_47], %95 {strides = array<i32>} : memref<16x64xf32, #tpu.memory_space<vmem>>, vector<1x64xf32>,
    %c8_i32 = arith.constant 8 : i32
    %97 = arith.addi %0, %c8_i32 : i32
    %98 = arith.index_cast %97 : i32 to index
    %99 = memref.load %arg1[%98] : memref<16xi32, #tpu.memory_space<smem>>
    %100 = arith.index_cast %99 : i32 to index
    %c0_48 = arith.constant 0 : index
    %101 = vector.load %arg3[%100, %c0_48] : memref<50x128xf32, #tpu.memory_space<vmem>>, vector<1x128xf32>
    %c8 = arith.constant 8 : index
    %c0_49 = arith.constant 0 : index
    %102 = vector.load %arg5[%c8, %c0_49] : memref<16x128xf32, #tpu.memory_space<vmem>>, vector<1x128xf32>
    tpu.vector_store %arg5[%c8, %c0_49], %101 {strides = array<i32>} : memref<16x128xf32, #tpu.memory_space<vmem>>, vector<1x128xf32>,
    %c8_i32_50 = arith.constant 8 : i32
    %103 = arith.addi %0, %c8_i32_50 : i32
    %104 = arith.index_cast %103 : i32 to index
    %105 = memref.load %arg2[%104] : memref<16xi32, #tpu.memory_space<smem>>
    %106 = arith.index_cast %105 : i32 to index
    %c0_51 = arith.constant 0 : index
    %107 = vector.load %arg4[%106, %c0_51] : memref<17x64xf32, #tpu.memory_space<vmem>>, vector<1x64xf32>
    %c8_52 = arith.constant 8 : index
    %c0_53 = arith.constant 0 : index
    %108 = vector.load %arg6[%c8_52, %c0_53] : memref<16x64xf32, #tpu.memory_space<vmem>>, vector<1x64xf32>
    tpu.vector_store %arg6[%c8_52, %c0_53], %107 {strides = array<i32>} : memref<16x64xf32, #tpu.memory_space<vmem>>, vector<1x64xf32>,
    %c9_i32 = arith.constant 9 : i32
    %109 = arith.addi %0, %c9_i32 : i32
    %110 = arith.index_cast %109 : i32 to index
    %111 = memref.load %arg1[%110] : memref<16xi32, #tpu.memory_space<smem>>
    %112 = arith.index_cast %111 : i32 to index
    %c0_54 = arith.constant 0 : index
    %113 = vector.load %arg3[%112, %c0_54] : memref<50x128xf32, #tpu.memory_space<vmem>>, vector<1x128xf32>
    %c9 = arith.constant 9 : index
    %c0_55 = arith.constant 0 : index
    %114 = vector.load %arg5[%c9, %c0_55] : memref<16x128xf32, #tpu.memory_space<vmem>>, vector<1x128xf32>
    tpu.vector_store %arg5[%c9, %c0_55], %113 {strides = array<i32>} : memref<16x128xf32, #tpu.memory_space<vmem>>, vector<1x128xf32>,
    %c9_i32_56 = arith.constant 9 : i32
    %115 = arith.addi %0, %c9_i32_56 : i32
    %116 = arith.index_cast %115 : i32 to index
    %117 = memref.load %arg2[%116] : memref<16xi32, #tpu.memory_space<smem>>
    %118 = arith.index_cast %117 : i32 to index
    %c0_57 = arith.constant 0 : index
    %119 = vector.load %arg4[%118, %c0_57] : memref<17x64xf32, #tpu.memory_space<vmem>>, vector<1x64xf32>
    %c9_58 = arith.constant 9 : index
    %c0_59 = arith.constant 0 : index
    %120 = vector.load %arg6[%c9_58, %c0_59] : memref<16x64xf32, #tpu.memory_space<vmem>>, vector<1x64xf32>
    tpu.vector_store %arg6[%c9_58, %c0_59], %119 {strides = array<i32>} : memref<16x64xf32, #tpu.memory_space<vmem>>, vector<1x64xf32>,
    %c10_i32 = arith.constant 10 : i32
    %121 = arith.addi %0, %c10_i32 : i32
    %122 = arith.index_cast %121 : i32 to index
    %123 = memref.load %arg1[%122] : memref<16xi32, #tpu.memory_space<smem>>
    %124 = arith.index_cast %123 : i32 to index
    %c0_60 = arith.constant 0 : index
    %125 = vector.load %arg3[%124, %c0_60] : memref<50x128xf32, #tpu.memory_space<vmem>>, vector<1x128xf32>
    %c10 = arith.constant 10 : index
    %c0_61 = arith.constant 0 : index
    %126 = vector.load %arg5[%c10, %c0_61] : memref<16x128xf32, #tpu.memory_space<vmem>>, vector<1x128xf32>
    tpu.vector_store %arg5[%c10, %c0_61], %125 {strides = array<i32>} : memref<16x128xf32, #tpu.memory_space<vmem>>, vector<1x128xf32>,
    %c10_i32_62 = arith.constant 10 : i32
    %127 = arith.addi %0, %c10_i32_62 : i32
    %128 = arith.index_cast %127 : i32 to index
    %129 = memref.load %arg2[%128] : memref<16xi32, #tpu.memory_space<smem>>
    %130 = arith.index_cast %129 : i32 to index
    %c0_63 = arith.constant 0 : index
    %131 = vector.load %arg4[%130, %c0_63] : memref<17x64xf32, #tpu.memory_space<vmem>>, vector<1x64xf32>
    %c10_64 = arith.constant 10 : index
    %c0_65 = arith.constant 0 : index
    %132 = vector.load %arg6[%c10_64, %c0_65] : memref<16x64xf32, #tpu.memory_space<vmem>>, vector<1x64xf32>
    tpu.vector_store %arg6[%c10_64, %c0_65], %131 {strides = array<i32>} : memref<16x64xf32, #tpu.memory_space<vmem>>, vector<1x64xf32>,
    %c11_i32 = arith.constant 11 : i32
    %133 = arith.addi %0, %c11_i32 : i32
    %134 = arith.index_cast %133 : i32 to index
    %135 = memref.load %arg1[%134] : memref<16xi32, #tpu.memory_space<smem>>
    %136 = arith.index_cast %135 : i32 to index
    %c0_66 = arith.constant 0 : index
    %137 = vector.load %arg3[%136, %c0_66] : memref<50x128xf32, #tpu.memory_space<vmem>>, vector<1x128xf32>
    %c11 = arith.constant 11 : index
    %c0_67 = arith.constant 0 : index
    %138 = vector.load %arg5[%c11, %c0_67] : memref<16x128xf32, #tpu.memory_space<vmem>>, vector<1x128xf32>
    tpu.vector_store %arg5[%c11, %c0_67], %137 {strides = array<i32>} : memref<16x128xf32, #tpu.memory_space<vmem>>, vector<1x128xf32>,
    %c11_i32_68 = arith.constant 11 : i32
    %139 = arith.addi %0, %c11_i32_68 : i32
    %140 = arith.index_cast %139 : i32 to index
    %141 = memref.load %arg2[%140] : memref<16xi32, #tpu.memory_space<smem>>
    %142 = arith.index_cast %141 : i32 to index
    %c0_69 = arith.constant 0 : index
    %143 = vector.load %arg4[%142, %c0_69] : memref<17x64xf32, #tpu.memory_space<vmem>>, vector<1x64xf32>
    %c11_70 = arith.constant 11 : index
    %c0_71 = arith.constant 0 : index
    %144 = vector.load %arg6[%c11_70, %c0_71] : memref<16x64xf32, #tpu.memory_space<vmem>>, vector<1x64xf32>
    tpu.vector_store %arg6[%c11_70, %c0_71], %143 {strides = array<i32>} : memref<16x64xf32, #tpu.memory_space<vmem>>, vector<1x64xf32>,
    %c12_i32 = arith.constant 12 : i32
    %145 = arith.addi %0, %c12_i32 : i32
    %146 = arith.index_cast %145 : i32 to index
    %147 = memref.load %arg1[%146] : memref<16xi32, #tpu.memory_space<smem>>
    %148 = arith.index_cast %147 : i32 to index
    %c0_72 = arith.constant 0 : index
    %149 = vector.load %arg3[%148, %c0_72] : memref<50x128xf32, #tpu.memory_space<vmem>>, vector<1x128xf32>
    %c12 = arith.constant 12 : index
    %c0_73 = arith.constant 0 : index
    %150 = vector.load %arg5[%c12, %c0_73] : memref<16x128xf32, #tpu.memory_space<vmem>>, vector<1x128xf32>
    tpu.vector_store %arg5[%c12, %c0_73], %149 {strides = array<i32>} : memref<16x128xf32, #tpu.memory_space<vmem>>, vector<1x128xf32>,
    %c12_i32_74 = arith.constant 12 : i32
    %151 = arith.addi %0, %c12_i32_74 : i32
    %152 = arith.index_cast %151 : i32 to index
    %153 = memref.load %arg2[%152] : memref<16xi32, #tpu.memory_space<smem>>
    %154 = arith.index_cast %153 : i32 to index
    %c0_75 = arith.constant 0 : index
    %155 = vector.load %arg4[%154, %c0_75] : memref<17x64xf32, #tpu.memory_space<vmem>>, vector<1x64xf32>
    %c12_76 = arith.constant 12 : index
    %c0_77 = arith.constant 0 : index
    %156 = vector.load %arg6[%c12_76, %c0_77] : memref<16x64xf32, #tpu.memory_space<vmem>>, vector<1x64xf32>
    tpu.vector_store %arg6[%c12_76, %c0_77], %155 {strides = array<i32>} : memref<16x64xf32, #tpu.memory_space<vmem>>, vector<1x64xf32>,
    %c13_i32 = arith.constant 13 : i32
    %157 = arith.addi %0, %c13_i32 : i32
    %158 = arith.index_cast %157 : i32 to index
    %159 = memref.load %arg1[%158] : memref<16xi32, #tpu.memory_space<smem>>
    %160 = arith.index_cast %159 : i32 to index
    %c0_78 = arith.constant 0 : index
    %161 = vector.load %arg3[%160, %c0_78] : memref<50x128xf32, #tpu.memory_space<vmem>>, vector<1x128xf32>
    %c13 = arith.constant 13 : index
    %c0_79 = arith.constant 0 : index
    %162 = vector.load %arg5[%c13, %c0_79] : memref<16x128xf32, #tpu.memory_space<vmem>>, vector<1x128xf32>
    tpu.vector_store %arg5[%c13, %c0_79], %161 {strides = array<i32>} : memref<16x128xf32, #tpu.memory_space<vmem>>, vector<1x128xf32>,
    %c13_i32_80 = arith.constant 13 : i32
    %163 = arith.addi %0, %c13_i32_80 : i32
    %164 = arith.index_cast %163 : i32 to index
    %165 = memref.load %arg2[%164] : memref<16xi32, #tpu.memory_space<smem>>
    %166 = arith.index_cast %165 : i32 to index
    %c0_81 = arith.constant 0 : index
    %167 = vector.load %arg4[%166, %c0_81] : memref<17x64xf32, #tpu.memory_space<vmem>>, vector<1x64xf32>
    %c13_82 = arith.constant 13 : index
    %c0_83 = arith.constant 0 : index
    %168 = vector.load %arg6[%c13_82, %c0_83] : memref<16x64xf32, #tpu.memory_space<vmem>>, vector<1x64xf32>
    tpu.vector_store %arg6[%c13_82, %c0_83], %167 {strides = array<i32>} : memref<16x64xf32, #tpu.memory_space<vmem>>, vector<1x64xf32>,
    %c14_i32 = arith.constant 14 : i32
    %169 = arith.addi %0, %c14_i32 : i32
    %170 = arith.index_cast %169 : i32 to index
    %171 = memref.load %arg1[%170] : memref<16xi32, #tpu.memory_space<smem>>
    %172 = arith.index_cast %171 : i32 to index
    %c0_84 = arith.constant 0 : index
    %173 = vector.load %arg3[%172, %c0_84] : memref<50x128xf32, #tpu.memory_space<vmem>>, vector<1x128xf32>
    %c14 = arith.constant 14 : index
    %c0_85 = arith.constant 0 : index
    %174 = vector.load %arg5[%c14, %c0_85] : memref<16x128xf32, #tpu.memory_space<vmem>>, vector<1x128xf32>
    tpu.vector_store %arg5[%c14, %c0_85], %173 {strides = array<i32>} : memref<16x128xf32, #tpu.memory_space<vmem>>, vector<1x128xf32>,
    %c14_i32_86 = arith.constant 14 : i32
    %175 = arith.addi %0, %c14_i32_86 : i32
    %176 = arith.index_cast %175 : i32 to index
    %177 = memref.load %arg2[%176] : memref<16xi32, #tpu.memory_space<smem>>
    %178 = arith.index_cast %177 : i32 to index
    %c0_87 = arith.constant 0 : index
    %179 = vector.load %arg4[%178, %c0_87] : memref<17x64xf32, #tpu.memory_space<vmem>>, vector<1x64xf32>
    %c14_88 = arith.constant 14 : index
    %c0_89 = arith.constant 0 : index
    %180 = vector.load %arg6[%c14_88, %c0_89] : memref<16x64xf32, #tpu.memory_space<vmem>>, vector<1x64xf32>
    tpu.vector_store %arg6[%c14_88, %c0_89], %179 {strides = array<i32>} : memref<16x64xf32, #tpu.memory_space<vmem>>, vector<1x64xf32>,
    %c15_i32 = arith.constant 15 : i32
    %181 = arith.addi %0, %c15_i32 : i32
    %182 = arith.index_cast %181 : i32 to index
    %183 = memref.load %arg1[%182] : memref<16xi32, #tpu.memory_space<smem>>
    %184 = arith.index_cast %183 : i32 to index
    %c0_90 = arith.constant 0 : index
    %185 = vector.load %arg3[%184, %c0_90] : memref<50x128xf32, #tpu.memory_space<vmem>>, vector<1x128xf32>
    %c15 = arith.constant 15 : index
    %c0_91 = arith.constant 0 : index
    %186 = vector.load %arg5[%c15, %c0_91] : memref<16x128xf32, #tpu.memory_space<vmem>>, vector<1x128xf32>
    tpu.vector_store %arg5[%c15, %c0_91], %185 {strides = array<i32>} : memref<16x128xf32, #tpu.memory_space<vmem>>, vector<1x128xf32>,
    %c15_i32_92 = arith.constant 15 : i32
    %187 = arith.addi %0, %c15_i32_92 : i32
    %188 = arith.index_cast %187 : i32 to index
    %189 = memref.load %arg2[%188] : memref<16xi32, #tpu.memory_space<smem>>
    %190 = arith.index_cast %189 : i32 to index
    %c0_93 = arith.constant 0 : index
    %191 = vector.load %arg4[%190, %c0_93] : memref<17x64xf32, #tpu.memory_space<vmem>>, vector<1x64xf32>
    %c15_94 = arith.constant 15 : index
    %c0_95 = arith.constant 0 : index
    %192 = vector.load %arg6[%c15_94, %c0_95] : memref<16x64xf32, #tpu.memory_space<vmem>>, vector<1x64xf32>
    tpu.vector_store %arg6[%c15_94, %c0_95], %191 {strides = array<i32>} : memref<16x64xf32, #tpu.memory_space<vmem>>, vector<1x64xf32>,
    return
  }
  func.func @transform_0(%arg0: i32, %arg1: memref<16xi32, #tpu.memory_space<smem>>, %arg2: memref<16xi32, #tpu.memory_space<smem>>) -> (i32, i32) {
    %c0_i32 = arith.constant 0 : i32
    %c0_i32_0 = arith.constant 0 : i32
    %c0_i32_1 = arith.constant 0 : i32
    return %c0_i32, %c0_i32_0 : i32, i32
  }
  func.func @transform_1(%arg0: i32, %arg1: memref<16xi32, #tpu.memory_space<smem>>, %arg2: memref<16xi32, #tpu.memory_space<smem>>) -> (i32, i32) {
    %c0_i32 = arith.constant 0 : i32
    %c0_i32_0 = arith.constant 0 : i32
    %c0_i32_1 = arith.constant 0 : i32
    return %c0_i32, %c0_i32_0 : i32, i32
  }
  func.func @transform_2(%arg0: i32, %arg1: memref<16xi32, #tpu.memory_space<smem>>, %arg2: memref<16xi32, #tpu.memory_space<smem>>) -> (i32, i32) {
    %c0_i32 = arith.constant 0 : i32
    %c0_i32_0 = arith.constant 0 : i32
    return %arg0, %c0_i32 : i32, i32
  }
  func.func @transform_3(%arg0: i32, %arg1: memref<16xi32, #tpu.memory_space<smem>>, %arg2: memref<16xi32, #tpu.memory_space<smem>>) -> (i32, i32) {
    %c0_i32 = arith.constant 0 : i32
    %c0_i32_0 = arith.constant 0 : i32
    return %arg0, %c0_i32 : i32, i32
  }
}

</mosaic_0001>

<bundles_post_ra>
// kernel: tpu_custom_call.1
= control target key start
LH: loop header
LB: loop body
LE: loop exit
PB: predicated region body
PF: predicated region fallthrough
CT: control target
= control target key end

     0   :  { %s412_s18 = smov [#allocation3]   ;;  %s496_s0 = inlined_call_operand.hbm [shape: s32[16], index: 0, kind: input, shape index: {}]   ;;  %s497_s2 = inlined_call_operand.hbm [shape: f32[50,128], index: 2, kind: input, shape index: {}]   ;;  %s498_s3 = inlined_call_operand.hbm [shape: f32[17,64], index: 3, kind: input, shape index: {}]   ;;  %s499_s4 = inlined_call_operand.hbm [shape: f32[16,128], index: 4, kind: output, shape index: {0}]   ;;  %s500_s5 = inlined_call_operand.hbm [shape: f32[16,64], index: 5, kind: output, shape index: {1}]   ;;  %s501_s1 = inlined_call_operand.vmem [shape: s32[16], index: 1, kind: input, shape index: {}]  }
   0x1   :  { %12 = dma.hbm_to_smem %s496_s0, 16, %s412_s18, [#allocation2] }
   0x2   :  { %s13_s23 = sshll.u32 %s501_s1, 4  ;;  %s14_s23 = int_to_ptr.vmem [resolvable:$true] %s13_s23 }
   0x3   :  { %s310_s24 = scalar_lea.vmem %s14_s23, 16  ;;  %p315_p1 = scmp.lt.s32.totalorder %s14_s23, %s14_s23 }
   0x4   :  { %p311_p0 = scmp.ne.s32.totalorder %s14_s23, %s310_s24  ;;  %p316_p2 = scmp.lt.s32.totalorder %s310_s24, %s310_s24 }
   0x6   :  { %p317_p3 = por %p316_p2, %p315_p1 }
   0x8   :  { %p318_p4 = pnand %p317_p3, %p311_p0 }
   0xa   :  { %321 = shalt.err (!%p318_p4)  }
   0xb   :  { %s413_s25 = smov [#allocation4]  }
   0xc   :  { %16 = dma.vmem_to_smem %s14_s23, 16, %s413_s25, [#allocation2] }
   0xd   :  { %402 = dma.done.wait [#allocation2], 32 }
   0xe   :  { %403 = vsyncadd [#allocation2], 4294967264 }
   0xf   :  { %18 = sfence }
  0x10   :  { %19 = vsyncpa [#allocation6], 0 }
  0x11   :  { %20 = vsyncpa [#allocation9], 0 }
  0x12   :  { %21 = vsyncpa [#allocation7], 0 }
  0x13   :  { %22 = vsyncpa [#allocation12], 0  ;;  %s414_s0 = smov [#allocation5]  }
  0x14   :  { %s28_s26 = sshll.u32 %s414_s0, 4  ;;  %s29_s26 = int_to_ptr.vmem [resolvable:$true] %s28_s26 }
  0x15   :  { %s330_s1 = scalar_lea.vmem %s29_s26, 896  ;;  %p335_p6 = scmp.lt.s32.totalorder %s29_s26, %s29_s26 }
  0x16   :  { %p331_p5 = scmp.ne.s32.totalorder %s29_s26, %s330_s1  ;;  %p336_p7 = scmp.lt.s32.totalorder %s330_s1, %s330_s1 }
  0x18   :  { %p337_p8 = por %p336_p7, %p335_p6 }
  0x1a   :  { %p338_p9 = pnand %p337_p8, %p331_p5 }
  0x1c   :  { %341 = shalt.err (!%p338_p9)
}
  0x1d   :  { %s415_s27 = smov 128   ;;  %s416_s28 = smov 8  }
  0x1e   :  { %34 = dma.hbm_to_vmem [thread:$0]  %s497_s2, 896, %s29_s26, [#allocation6], %s415_s27, %s415_s27, %s416_s28  }
  0x1f   :  { %s417_s6 = smov [#allocation8]  }
  0x20   :  { %s40_s7 = sshll.u32 %s417_s6, 4  ;;  %s41_s7 = int_to_ptr.vmem [resolvable:$true] %s40_s7 }
  0x21   :  { %s350_s8 = scalar_lea.vmem %s41_s7, 384  ;;  %p355_p11 = scmp.lt.s32.totalorder %s41_s7, %s41_s7 }
  0x22   :  { %p351_p10 = scmp.ne.s32.totalorder %s41_s7, %s350_s8  ;;  %p356_p12 = scmp.lt.s32.totalorder %s350_s8, %s350_s8 }
  0x24   :  { %p357_p13 = por %p356_p12, %p355_p11 }
  0x26   :  { %p358_p0 = pnand %p357_p13, %p351_p10 }
  0x28   :  { %361 = shalt.err (!%p358_p0)
}
  0x29   :  { %46 = dma.hbm_to_vmem [thread:$0]  %s498_s3, 384, %s41_s7, [#allocation9], %s415_s27, %s415_s27, %s416_s28  }
  0x2a   :  { %404 = dma.done.wait [#allocation6], 896  }
  0x2b   :  { %405 = vsyncadd [#allocation6], 4294966400 }
  0x2c   :  { %406 = dma.done.wait [#allocation9], 384  }
  0x2d   :  { %407 = vsyncadd [#allocation9], 4294966912  ;;  %s54_s2 = sld [smem:[#allocation3]]  ;;  %vm61_vm0 = vcmask 516096  }
  0x2e   :  { %s58_s11 = sld [smem:[#allocation4]] }
  0x2f   :  { %s264_s12 = sld [smem:[#allocation3 + $0x1]] }
  0x30   :  { %s265_s13 = sld [smem:[#allocation4 + $0x1]] }
  0x31   :  { %s266_s14 = sld [smem:[#allocation3 + $0x2]] }
  0x32   :  { %s267_s15 = sld [smem:[#allocation4 + $0x2]] }
  0x33   :  { %s268_s16 = sld [smem:[#allocation3 + $0x3]]  ;;  %s55_s17 = scalar_lea.vmem [#allocation5], %s54_s2 }
  0x34   :  { %v56_v0 = vld [vmem:[%s55_s17] sm:$0x1]  ;;  %s269_s18 = sld [smem:[#allocation4 + $0x3]]  ;;  %s59_s19 = scalar_lea.vmem [#allocation8], %s58_s11 }
  0x35   :  { %57 = vst [vmem:[#allocation10] sm:$0x1] %v56_v0  ;;  %v60_v1 = vld [vmem:[%s59_s19] sm:$0x1]  ;;  %s270_s20 = sld [smem:[#allocation3 + $0x4]]  ;;  %s65_s3 = scalar_lea.vmem [#allocation5], %s264_s12 }
  0x36   :  { %62 = vst.msk [vmem:[#allocation11] sm:$0x1] %vm61_vm0, %v60_v1  ;;  %v66_v2 = vld [vmem:[%s65_s3] sm:$0x1]  ;;  %s271_s21 = sld [smem:[#allocation4 + $0x4]]  ;;  %s69_s22 = scalar_lea.vmem [#allocation8], %s265_s13 }
  0x37   :  { %67 = vst [vmem:[#allocation10 + $0x1] sm:$0x1] %v66_v2  ;;  %v70_v3 = vld [vmem:[%s69_s22] sm:$0x1]  ;;  %s272_s23 = sld [smem:[#allocation3 + $0x5]]  ;;  %s74_s24 = scalar_lea.vmem [#allocation5], %s266_s14 }
  0x38   :  { %71 = vst.msk [vmem:[#allocation11 + $0x1] sm:$0x1] %vm61_vm0, %v70_v3  ;;  %v75_v4 = vld [vmem:[%s74_s24] sm:$0x1]  ;;  %s273_s25 = sld [smem:[#allocation4 + $0x5]]  ;;  %s78_s0 = scalar_lea.vmem [#allocation8], %s267_s15 }
  0x39   :  { %76 = vst [vmem:[#allocation10 + $0x2] sm:$0x1] %v75_v4  ;;  %v79_v5 = vld [vmem:[%s78_s0] sm:$0x1]  ;;  %s274_s26 = sld [smem:[#allocation3 + $0x6]]  ;;  %s83_s1 = scalar_lea.vmem [#allocation5], %s268_s16 }
  0x3a   :  { %80 = vst.msk [vmem:[#allocation11 + $0x2] sm:$0x1] %vm61_vm0, %v79_v5  ;;  %v84_v6 = vld [vmem:[%s83_s1] sm:$0x1]  ;;  %s275_s29 = sld [smem:[#allocation4 + $0x6]]  ;;  %s87_s30 = scalar_lea.vmem [#allocation8], %s269_s18 }
  0x3b   :  { %85 = vst [vmem:[#allocation10 + $0x3] sm:$0x1] %v84_v6  ;;  %v88_v7 = vld [vmem:[%s87_s30] sm:$0x1]  ;;  %s276_s6 = sld [smem:[#allocation3 + $0x7]]  ;;  %s92_s7 = scalar_lea.vmem [#allocation5], %s270_s20 }
  0x3c   :  { %89 = vst.msk [vmem:[#allocation11 + $0x3] sm:$0x1] %vm61_vm0, %v88_v7  ;;  %v93_v8 = vld [vmem:[%s92_s7] sm:$0x1]  ;;  %s277_s8 = sld [smem:[#allocation4 + $0x7]]  ;;  %s96_s9 = scalar_lea.vmem [#allocation8], %s271_s21 }
  0x3d   :  { %94 = vst [vmem:[#allocation10 + $0x4] sm:$0x1] %v93_v8  ;;  %v97_v9 = vld [vmem:[%s96_s9] sm:$0x1]  ;;  %s278_s10 = sld [smem:[#allocation3 + $0x8]]  ;;  %s101_s2 = scalar_lea.vmem [#allocation5], %s272_s23 }
  0x3e   :  { %98 = vst.msk [vmem:[#allocation11 + $0x4] sm:$0x1] %vm61_vm0, %v97_v9  ;;  %v102_v10 = vld [vmem:[%s101_s2] sm:$0x1]  ;;  %s279_s11 = sld [smem:[#allocation4 + $0x8]]  ;;  %s105_s12 = scalar_lea.vmem [#allocation8], %s273_s25 }
  0x3f   :  { %103 = vst [vmem:[#allocation10 + $0x5] sm:$0x1] %v102_v10  ;;  %v106_v11 = vld [vmem:[%s105_s12] sm:$0x1]  ;;  %s280_s13 = sld [smem:[#allocation3 + $0x9]]  ;;  %s110_s14 = scalar_lea.vmem [#allocation5], %s274_s26 }
  0x40   :  { %107 = vst.msk [vmem:[#allocation11 + $0x5] sm:$0x1] %vm61_vm0, %v106_v11  ;;  %v111_v12 = vld [vmem:[%s110_s14] sm:$0x1]  ;;  %s281_s15 = sld [smem:[#allocation4 + $0x9]]  ;;  %s114_s16 = scalar_lea.vmem [#allocation8], %s275_s29 }
  0x41   :  { %112 = vst [vmem:[#allocation10 + $0x6] sm:$0x1] %v111_v12  ;;  %v115_v13 = vld [vmem:[%s114_s16] sm:$0x1]  ;;  %s282_s17 = sld [smem:[#allocation3 + $0xa]]  ;;  %s119_s18 = scalar_lea.vmem [#allocation5], %s276_s6 }
  0x42   :  { %116 = vst.msk [vmem:[#allocation11 + $0x6] sm:$0x1] %vm61_vm0, %v115_v13  ;;  %v120_v14 = vld [vmem:[%s119_s18] sm:$0x1]  ;;  %s283_s19 = sld [smem:[#allocation4 + $0xa]]  ;;  %s123_s20 = scalar_lea.vmem [#allocation8], %s277_s8 }
  0x43   :  { %121 = vst [vmem:[#allocation10 + $0x7] sm:$0x1] %v120_v14  ;;  %v124_v15 = vld [vmem:[%s123_s20] sm:$0x1]  ;;  %s284_s3 = sld [smem:[#allocation3 + $0xb]]  ;;  %s128_s21 = scalar_lea.vmem [#allocation5], %s278_s10 }
  0x44   :  { %125 = vst.msk [vmem:[#allocation11 + $0x7] sm:$0x1] %vm61_vm0, %v124_v15  ;;  %v129_v16 = vld [vmem:[%s128_s21] sm:$0x1]  ;;  %s285_s22 = sld [smem:[#allocation4 + $0xb]]  ;;  %s132_s23 = scalar_lea.vmem [#allocation8], %s279_s11 }
  0x45   :  { %130 = vst [vmem:[#allocation10 + $0x8] sm:$0x1] %v129_v16  ;;  %v133_v17 = vld [vmem:[%s132_s23] sm:$0x1]  ;;  %s286_s24 = sld [smem:[#allocation3 + $0xc]]  ;;  %s137_s25 = scalar_lea.vmem [#allocation5], %s280_s13 }
  0x46   :  { %134 = vst.msk [vmem:[#allocation11 + $0x8] sm:$0x1] %vm61_vm0, %v133_v17  ;;  %v138_v18 = vld [vmem:[%s137_s25] sm:$0x1]  ;;  %s287_s0 = sld [smem:[#allocation4 + $0xc]]  ;;  %s141_s26 = scalar_lea.vmem [#allocation8], %s281_s15 }
  0x47   :  { %139 = vst [vmem:[#allocation10 + $0x9] sm:$0x1] %v138_v18  ;;  %v142_v19 = vld [vmem:[%s141_s26] sm:$0x1]  ;;  %s288_s1 = sld [smem:[#allocation3 + $0xd]]  ;;  %s146_s29 = scalar_lea.vmem [#allocation5], %s282_s17 }
  0x48   :  { %143 = vst.msk [vmem:[#allocation11 + $0x9] sm:$0x1] %vm61_vm0, %v142_v19  ;;  %v147_v20 = vld [vmem:[%s146_s29] sm:$0x1]  ;;  %s289_s30 = sld [smem:[#allocation4 + $0xd]]  ;;  %s150_s6 = scalar_lea.vmem [#allocation8], %s283_s19 }
  0x49   :  { %148 = vst [vmem:[#allocation10 + $0xa] sm:$0x1] %v147_v20  ;;  %v151_v21 = vld [vmem:[%s150_s6] sm:$0x1]  ;;  %s290_s7 = sld [smem:[#allocation3 + $0xe]]  ;;  %s155_s8 = scalar_lea.vmem [#allocation5], %s284_s3 }
  0x4a   :  { %152 = vst.msk [vmem:[#allocation11 + $0xa] sm:$0x1] %vm61_vm0, %v151_v21  ;;  %v156_v22 = vld [vmem:[%s155_s8] sm:$0x1]  ;;  %s291_s9 = sld [smem:[#allocation4 + $0xe]]  ;;  %s159_s10 = scalar_lea.vmem [#allocation8], %s285_s22 }
  0x4b   :  { %157 = vst [vmem:[#allocation10 + $0xb] sm:$0x1] %v156_v22  ;;  %v160_v23 = vld [vmem:[%s159_s10] sm:$0x1]  ;;  %s292_s2 = sld [smem:[#allocation3 + $0xf]]  ;;  %s164_s11 = scalar_lea.vmem [#allocation5], %s286_s24 }
  0x4c   :  { %161 = vst.msk [vmem:[#allocation11 + $0xb] sm:$0x1] %vm61_vm0, %v160_v23  ;;  %v165_v24 = vld [vmem:[%s164_s11] sm:$0x1]  ;;  %s293_s12 = sld [smem:[#allocation4 + $0xf]]  ;;  %s168_s13 = scalar_lea.vmem [#allocation8], %s287_s0 }
  0x4d   :  { %166 = vst [vmem:[#allocation10 + $0xc] sm:$0x1] %v165_v24  ;;  %v169_v25 = vld [vmem:[%s168_s13] sm:$0x1]  ;;  %s173_s14 = scalar_lea.vmem [#allocation5], %s288_s1  ;;  %s418_s15 = smov [#allocation10]  }
  0x4e   :  { %170 = vst.msk [vmem:[#allocation11 + $0xc] sm:$0x1] %vm61_vm0, %v169_v25  ;;  %v174_v26 = vld [vmem:[%s173_s14] sm:$0x1]  ;;  %s203_s16 = sshll.u32 %s418_s15, 4  ;;  %s177_s17 = scalar_lea.vmem [#allocation8], %s289_s30  ;;  %s204_s16 = int_to_ptr.vmem [resolvable:$true] %s203_s16 }
  0x4f   :  { %175 = vst [vmem:[#allocation10 + $0xd] sm:$0x1] %v174_v26  ;;  %v178_v27 = vld [vmem:[%s177_s17] sm:$0x1]  ;;  %s419_s18 = smov [#allocation11]   ;;  %s182_s20 = scalar_lea.vmem [#allocation5], %s290_s7 }
  0x50   :  { %s215_s19 = sshll.u32 %s419_s18, 4  ;;  %179 = vst.msk [vmem:[#allocation11 + $0xd] sm:$0x1] %vm61_vm0, %v178_v27  ;;  %v183_v28 = vld [vmem:[%s182_s20] sm:$0x1]  ;;  %s186_s3 = scalar_lea.vmem [#allocation8], %s291_s9  ;;  %s216_s19 = int_to_ptr.vmem [resolvable:$true] %s215_s19 }
  0x51   :  { %184 = vst [vmem:[#allocation10 + $0xe] sm:$0x1] %v183_v28  ;;  %v187_v29 = vld [vmem:[%s186_s3] sm:$0x1]  ;;  %s191_s21 = scalar_lea.vmem [#allocation5], %s292_s2  ;;  %s362_s23 = scalar_lea.vmem %s204_s16, 256 }
  0x52   :  { %188 = vst.msk [vmem:[#allocation11 + $0xe] sm:$0x1] %vm61_vm0, %v187_v29  ;;  %v192_v30 = vld [vmem:[%s191_s21] sm:$0x1]  ;;  %s195_s22 = scalar_lea.vmem [#allocation8], %s293_s12  ;;  %p363_p1 = scmp.ne.s32.totalorder %s204_s16, %s362_s23 }
  0x53   :  { %193 = vst [vmem:[#allocation10 + $0xf] sm:$0x1] %v192_v30  ;;  %v196_v31 = vld [vmem:[%s195_s22] sm:$0x1]  ;;  %p367_p2 = scmp.lt.s32.totalorder %s204_s16, %s204_s16  ;;  %p368_p3 = scmp.lt.s32.totalorder %s362_s23, %s362_s23 }
  0x54   :  { %197 = vst.msk [vmem:[#allocation11 + $0xf] sm:$0x1] %vm61_vm0, %v196_v31 }
  0x55   :  { %p369_p4 = por %p368_p3, %p367_p2 }
  0x57   :  { %p370_p5 = pnand %p369_p4, %p363_p1 }
  0x59   :  { %373 = shalt.err (!%p370_p5)
}
  0x5a   :  { %209 = dma.vmem_to_hbm [thread:$0]  %s204_s16, 256, %s499_s4, [#allocation7], %s415_s27, %s415_s27, %s416_s28  }
  0x5b   :  { %s382_s0 = scalar_lea.vmem %s216_s19, 256  ;;  %p387_p7 = scmp.lt.s32.totalorder %s216_s19, %s216_s19 }
  0x5c   :  { %p383_p6 = scmp.ne.s32.totalorder %s216_s19, %s382_s0  ;;  %p388_p8 = scmp.lt.s32.totalorder %s382_s0, %s382_s0 }
  0x5e   :  { %p389_p9 = por %p388_p8, %p387_p7 }
  0x60   :  { %p390_p10 = pnand %p389_p9, %p383_p6 }
  0x62   :  { %393 = shalt.err (!%p390_p10)
}
  0x63   :  { %221 = dma.vmem_to_hbm [thread:$0]  %s216_s19, 256, %s500_s5, [#allocation12], %s415_s27, %s415_s27, %s416_s28  }
  0x64   :  { %408 = dma.done.wait [#allocation7], 256  }
  0x65   :  { %409 = vsyncadd [#allocation7], 4294967040 }
  0x66   :  { %410 = dma.done.wait [#allocation12], 256  }
  0x67   :  { %411 = vsyncadd [#allocation12], 4294967040 }
  0x68   :  { %228 = vsyncpa [#allocation6], 1 }
  0x69   :  { %229 = vsyncpa [#allocation9], 1 }
  0x6a   :  { %230 = vsyncpa [#allocation7], 1 }
  0x6b   :  { %231 = vsyncpa [#allocation12], 1 }

</bundles_post_ra>
